<compile_context>
chip_gen: v7x
topology: tpu7x:2x2x1
jax: 0.10.0
libtpu: 0.0.40
codegen_flags: <defaults>
</compile_context>

<pallas_src>
import jax
import jax.numpy as jnp
from jax.experimental import pallas as pl
from jax.experimental.pallas import tpu as pltpu


def _round_up(x, m):
    return (x + m - 1) // m * m


# ----------------------------------------------------------------------------
# Fused whole-network Pallas kernel
# ----------------------------------------------------------------------------
def _make_fc_only_kernel(num_hidden, num_classes):
    """Kernel refs: x, (W, b) * num_hidden, W_last, b_last, out."""

    def kernel(*refs):
        x_ref = refs[0]
        o_ref = refs[-1]

        h = x_ref[...]                                    # bf16 (Mp, F0p)
        idx = 1
        for _ in range(num_hidden):
            w = refs[idx][...]                            # bf16 (Fin_p, Fout_p)
            b = refs[idx + 1][...]                        # f32  (1, Fout_p)
            idx += 2
            y = jnp.dot(h, w, preferred_element_type=jnp.float32) + b
            h = jnp.maximum(y, 0.0).astype(jnp.bfloat16)
            # TODO(synk): train-mode Dropout would need pltpu.prng_* masking;
            # eval-mode forward is the identity, so nothing is applied here.

        w_last = refs[idx][...]                           # bf16 (Fin_p, Cp)
        b_last = refs[idx + 1][...]                       # f32  (1, Cp)
        logits = jnp.dot(h, w_last, preferred_element_type=jnp.float32) + b_last

        # log_softmax over the real classes only (mask padded lanes).
        col = jax.lax.broadcasted_iota(jnp.int32, logits.shape, 1)
        masked = jnp.where(col < num_classes, logits, -jnp.inf)
        m = jnp.max(masked, axis=1, keepdims=True)
        lse = m + jnp.log(jnp.sum(jnp.exp(masked - m), axis=1, keepdims=True))
        o_ref[...] = logits - lse

    return kernel


# ----------------------------------------------------------------------------
# Parameter prep (pad + transpose + bf16 cast, done once) and forward wrapper
# ----------------------------------------------------------------------------
def prepare_fc_only_params(params):
    """PyTorch-layout (out,in) weights -> padded (in_p, out_p) bf16 + (1,out_p) f32 bias."""

    def prep(W, b):
        out_f, in_f = W.shape
        in_p, out_p = _round_up(in_f, 128), _round_up(out_f, 128)
        Wp = jnp.zeros((in_p, out_p), jnp.bfloat16)
        Wp = Wp.at[:in_f, :out_f].set(W.T.astype(jnp.bfloat16))
        bp = jnp.zeros((1, out_p), jnp.float32).at[0, :out_f].set(
            b.astype(jnp.float32))
        return Wp, bp

    hidden = [prep(W, b) for (W, b) in params["hidden"]]
    last = prep(*params["last"])
    return {"hidden": hidden, "last": last,
            "num_classes": int(params["last"][0].shape[0])}


def fc_only_forward(x, padded_params):
    """Forward pass of fc_only: flatten -> hidden FCs -> final FC -> log_softmax."""
    n = x.shape[0]
    x2 = x.reshape(n, -1)                                 # nn.Flatten
    f_in = x2.shape[1]

    hidden = padded_params["hidden"]
    w_last, b_last = padded_params["last"]
    num_classes = padded_params["num_classes"]

    mp = _round_up(n, 8)
    f0p = hidden[0][0].shape[0] if hidden else w_last.shape[0]
    cp = w_last.shape[1]

    # Pad the input once (rows to a sublane multiple, features to a lane multiple).
    x_p = jnp.zeros((mp, f0p), jnp.bfloat16).at[:n, :f_in].set(
        x2.astype(jnp.bfloat16))

    operands = [x_p]
    for (w, b) in hidden:
        operands += [w, b]
    operands += [w_last, b_last]

    def full_spec(arr):
        return pl.BlockSpec(arr.shape, lambda i: (0, 0))

    out = pl.pallas_call(
        _make_fc_only_kernel(len(hidden), num_classes),
        out_shape=jax.ShapeDtypeStruct((mp, cp), jnp.float32),
        grid=(1,),
        in_specs=[full_spec(a) for a in operands],
        out_specs=pl.BlockSpec((mp, cp), lambda i: (0, 0)),
        compiler_params=pltpu.CompilerParams(
            dimension_semantics=("arbitrary",)),
    )(*operands)
    return out[:n, :num_classes]


# ----------------------------------------------------------------------------
# Deterministic parameters (PyTorch nn.Linear-style init) + pure-JAX reference
# ----------------------------------------------------------------------------
def make_params(key, sizelist):
    def linear_init(key, fan_in, fan_out):
        k1, k2 = jax.random.split(key)
        bound = float(fan_in) ** -0.5
        W = jax.random.uniform(k1, (fan_out, fan_in), jnp.float32, -bound, bound)
        b = jax.random.uniform(k2, (fan_out,), jnp.float32, -bound, bound)
        return W, b

    hidden = []
    for i in range(len(sizelist) - 2):
        key, sub = jax.random.split(key)
        hidden.append(linear_init(sub, sizelist[i], sizelist[i + 1]))
    key, sub = jax.random.split(key)
    last = linear_init(sub, sizelist[-2], sizelist[-1])
    return {"hidden": hidden, "last": last}


def reference_forward(x, params):
    n = x.shape[0]
    h = x.reshape(n, -1)
    for (W, b) in params["hidden"]:
        h = jnp.maximum(
            jnp.dot(h, W.T, precision=jax.lax.Precision.HIGHEST) + b, 0.0)
        # Dropout is identity in eval mode.
    W, b = params["last"]
    logits = jnp.dot(h, W.T, precision=jax.lax.Precision.HIGHEST) + b
    return jax.nn.log_softmax(logits, axis=1)


if __name__ == "__main__":
    key = jax.random.PRNGKey(0)
    key, kx = jax.random.split(key)

    # fc_only(sizelist=[64, 32, 32, 10], droplist=[0.5, 0.5]) on a (2, 4, 16)
    # input (flattened to 64 features).  Dropout is identity in this
    # inference-style forward pass, so droplist only documents the config.
    batch, channels, seq = 2, 4, 16
    sizelist = [channels * seq, 32, 32, 10]
    droplist = [0.5, 0.5]

    x = jax.random.normal(kx, (batch, channels, seq), jnp.float32)
    params = make_params(key, sizelist)
    padded_params = prepare_fc_only_params(params)

    out = jax.block_until_ready(fc_only_forward(x, padded_params))
    assert out.shape == (batch, sizelist[-1])

    ref = jax.block_until_ready(reference_forward(x, params))
    assert jnp.allclose(out, ref, atol=1e-2, rtol=1e-2), (
        f"mismatch: max abs diff {float(jnp.max(jnp.abs(out - ref)))}")

    print("KERNEL_OK")
</pallas_src>

<mosaic_0001>
module attributes {stable_mosaic.version = 11 : i64} {
  func.func @kernel(%arg0: i32, %arg1: memref<8x128xbf16, #tpu.memory_space<vmem>>, %arg2: memref<128x128xbf16, #tpu.memory_space<vmem>>, %arg3: memref<1x128xf32, #tpu.memory_space<vmem>>, %arg4: memref<128x128xbf16, #tpu.memory_space<vmem>>, %arg5: memref<1x128xf32, #tpu.memory_space<vmem>>, %arg6: memref<128x128xbf16, #tpu.memory_space<vmem>>, %arg7: memref<1x128xf32, #tpu.memory_space<vmem>>, %arg8: memref<8x128xf32, #tpu.memory_space<vmem>>) attributes {dimension_semantics = [#tpu.dimension_semantics<arbitrary>], iteration_bounds = array<i64: 1>, scalar_prefetch = 0 : i64, scratch_operands = 0 : i64, tpu.core_type = #tpu.core_type<tc>, window_params = [{pipeline_mode = #tpu.pipeline_mode<synchronous>, transform_indices = @transform_0, window_bounds = array<i64: 8, 128>}, {pipeline_mode = #tpu.pipeline_mode<synchronous>, transform_indices = @transform_1, window_bounds = array<i64: 128, 128>}, {pipeline_mode = #tpu.pipeline_mode<synchronous>, transform_indices = @transform_2, window_bounds = array<i64: 1, 128>}, {pipeline_mode = #tpu.pipeline_mode<synchronous>, transform_indices = @transform_3, window_bounds = array<i64: 128, 128>}, {pipeline_mode = #tpu.pipeline_mode<synchronous>, transform_indices = @transform_4, window_bounds = array<i64: 1, 128>}, {pipeline_mode = #tpu.pipeline_mode<synchronous>, transform_indices = @transform_5, window_bounds = array<i64: 128, 128>}, {pipeline_mode = #tpu.pipeline_mode<synchronous>, transform_indices = @transform_6, window_bounds = array<i64: 1, 128>}, {pipeline_mode = #tpu.pipeline_mode<synchronous>, transform_indices = @transform_7, window_bounds = array<i64: 8, 128>}]} {
    %c0 = arith.constant 0 : index
    %c0_0 = arith.constant 0 : index
    %0 = vector.load %arg1[%c0, %c0_0] : memref<8x128xbf16, #tpu.memory_space<vmem>>, vector<8x128xbf16>
    %c0_1 = arith.constant 0 : index
    %c0_2 = arith.constant 0 : index
    %1 = vector.load %arg2[%c0_1, %c0_2] : memref<128x128xbf16, #tpu.memory_space<vmem>>, vector<128x128xbf16>
    %c0_3 = arith.constant 0 : index
    %c0_4 = arith.constant 0 : index
    %2 = vector.load %arg3[%c0_3, %c0_4] : memref<1x128xf32, #tpu.memory_space<vmem>>, vector<1x128xf32>
    %cst = arith.constant dense<0.000000e+00> : vector<8x128xf32>
    %3 = tpu.matmul %0, %1, %cst {dimension_numbers = #tpu.dot_dimension_numbers<[1], [0], [0], [1], [0, 0, 1, 1], [], []>} : vector<8x128xbf16>, vector<128x128xbf16>, vector<8x128xf32> -> vector<8x128xf32>
    %4 = vector.broadcast %2 : vector<1x128xf32> to vector<8x128xf32>
    %5 = arith.addf %3, %4 : vector<8x128xf32>
    %cst_5 = arith.constant 0.000000e+00 : f32
    %6 = vector.broadcast %cst_5 : f32 to vector<8x128xf32>
    %7 = arith.maximumf %5, %6 : vector<8x128xf32>
    %8 = arith.truncf %7 : vector<8x128xf32> to vector<8x128xbf16>
    %c0_6 = arith.constant 0 : index
    %c0_7 = arith.constant 0 : index
    %9 = vector.load %arg4[%c0_6, %c0_7] : memref<128x128xbf16, #tpu.memory_space<vmem>>, vector<128x128xbf16>
    %c0_8 = arith.constant 0 : index
    %c0_9 = arith.constant 0 : index
    %10 = vector.load %arg5[%c0_8, %c0_9] : memref<1x128xf32, #tpu.memory_space<vmem>>, vector<1x128xf32>
    %cst_10 = arith.constant dense<0.000000e+00> : vector<8x128xf32>
    %11 = tpu.matmul %8, %9, %cst_10 {dimension_numbers = #tpu.dot_dimension_numbers<[1], [0], [0], [1], [0, 0, 1, 1], [], []>} : vector<8x128xbf16>, vector<128x128xbf16>, vector<8x128xf32> -> vector<8x128xf32>
    %12 = vector.broadcast %10 : vector<1x128xf32> to vector<8x128xf32>
    %13 = arith.addf %11, %12 : vector<8x128xf32>
    %cst_11 = arith.constant 0.000000e+00 : f32
    %14 = vector.broadcast %cst_11 : f32 to vector<8x128xf32>
    %15 = arith.maximumf %13, %14 : vector<8x128xf32>
    %16 = arith.truncf %15 : vector<8x128xf32> to vector<8x128xbf16>
    %c0_12 = arith.constant 0 : index
    %c0_13 = arith.constant 0 : index
    %17 = vector.load %arg6[%c0_12, %c0_13] : memref<128x128xbf16, #tpu.memory_space<vmem>>, vector<128x128xbf16>
    %c0_14 = arith.constant 0 : index
    %c0_15 = arith.constant 0 : index
    %18 = vector.load %arg7[%c0_14, %c0_15] : memref<1x128xf32, #tpu.memory_space<vmem>>, vector<1x128xf32>
    %cst_16 = arith.constant dense<0.000000e+00> : vector<8x128xf32>
    %19 = tpu.matmul %16, %17, %cst_16 {dimension_numbers = #tpu.dot_dimension_numbers<[1], [0], [0], [1], [0, 0, 1, 1], [], []>} : vector<8x128xbf16>, vector<128x128xbf16>, vector<8x128xf32> -> vector<8x128xf32>
    %20 = vector.broadcast %18 : vector<1x128xf32> to vector<8x128xf32>
    %21 = arith.addf %19, %20 : vector<8x128xf32>
    %22 = tpu.iota {dimensions = array<i32: 1>} : vector<8x128xi32>
    %c10_i32 = arith.constant 10 : i32
    %23 = vector.broadcast %c10_i32 : i32 to vector<8x128xi32>
    %24 = arith.cmpi slt, %22, %23 : vector<8x128xi32>
    %cst_17 = arith.constant 0xFF800000 : f32
    %25 = vector.broadcast %cst_17 : f32 to vector<8x128xf32>
    %26 = arith.select %24, %21, %25 : vector<8x128xi1>, vector<8x128xf32>
    %cst_18 = arith.constant dense<0xFF800000> : vector<8xf32>
    %27 = vector.multi_reduction <maximumf>, %26, %cst_18 [1] : vector<8x128xf32> to vector<8xf32>
    %28 = vector.shape_cast %27 : vector<8xf32> to vector<8x1xf32>
    %29 = vector.broadcast %28 : vector<8x1xf32> to vector<8x128xf32>
    %30 = arith.subf %26, %29 : vector<8x128xf32>
    %31 = math.exp %30 : vector<8x128xf32>
    %cst_19 = arith.constant dense<0.000000e+00> : vector<8xf32>
    %32 = vector.multi_reduction <add>, %31, %cst_19 [1] : vector<8x128xf32> to vector<8xf32>
    %33 = vector.shape_cast %32 : vector<8xf32> to vector<8x1xf32>
    %34 = math.log %33 : vector<8x1xf32>
    %35 = arith.addf %28, %34 : vector<8x1xf32>
    %36 = vector.broadcast %35 : vector<8x1xf32> to vector<8x128xf32>
    %37 = arith.subf %21, %36 : vector<8x128xf32>
    %c0_20 = arith.constant 0 : index
    %c0_21 = arith.constant 0 : index
    %38 = vector.load %arg8[%c0_20, %c0_21] : memref<8x128xf32, #tpu.memory_space<vmem>>, vector<8x128xf32>
    tpu.vector_store %arg8[%c0_20, %c0_21], %37 {strides = array<i32>} : memref<8x128xf32, #tpu.memory_space<vmem>>, vector<8x128xf32>,
    return
  }
  func.func @transform_0(%arg0: i32) -> (i32, i32) {
    %c0_i32 = arith.constant 0 : i32
    %c0_i32_0 = arith.constant 0 : i32
    %c0_i32_1 = arith.constant 0 : i32
    return %c0_i32, %c0_i32_0 : i32, i32
  }
  func.func @transform_1(%arg0: i32) -> (i32, i32) {
    %c0_i32 = arith.constant 0 : i32
    %c0_i32_0 = arith.constant 0 : i32
    %c0_i32_1 = arith.constant 0 : i32
    return %c0_i32, %c0_i32_0 : i32, i32
  }
  func.func @transform_2(%arg0: i32) -> (i32, i32) {
    %c0_i32 = arith.constant 0 : i32
    %c0_i32_0 = arith.constant 0 : i32
    %c0_i32_1 = arith.constant 0 : i32
    return %c0_i32, %c0_i32_0 : i32, i32
  }
  func.func @transform_3(%arg0: i32) -> (i32, i32) {
    %c0_i32 = arith.constant 0 : i32
    %c0_i32_0 = arith.constant 0 : i32
    %c0_i32_1 = arith.constant 0 : i32
    return %c0_i32, %c0_i32_0 : i32, i32
  }
  func.func @transform_4(%arg0: i32) -> (i32, i32) {
    %c0_i32 = arith.constant 0 : i32
    %c0_i32_0 = arith.constant 0 : i32
    %c0_i32_1 = arith.constant 0 : i32
    return %c0_i32, %c0_i32_0 : i32, i32
  }
  func.func @transform_5(%arg0: i32) -> (i32, i32) {
    %c0_i32 = arith.constant 0 : i32
    %c0_i32_0 = arith.constant 0 : i32
    %c0_i32_1 = arith.constant 0 : i32
    return %c0_i32, %c0_i32_0 : i32, i32
  }
  func.func @transform_6(%arg0: i32) -> (i32, i32) {
    %c0_i32 = arith.constant 0 : i32
    %c0_i32_0 = arith.constant 0 : i32
    %c0_i32_1 = arith.constant 0 : i32
    return %c0_i32, %c0_i32_0 : i32, i32
  }
  func.func @transform_7(%arg0: i32) -> (i32, i32) {
    %c0_i32 = arith.constant 0 : i32
    %c0_i32_0 = arith.constant 0 : i32
    %c0_i32_1 = arith.constant 0 : i32
    return %c0_i32, %c0_i32_0 : i32, i32
  }
}

</mosaic_0001>

<bundles_post_ra>
// kernel: tpu_custom_call.1
= control target key start
LH: loop header
LB: loop body
LE: loop exit
PB: predicated region body
PF: predicated region fallthrough
CT: control target
= control target key end

     0   :  { %12 = vsyncpa [#allocation3], 0  ;;  %s878_s0 = inlined_call_operand.hbm [shape: bf16[8,128], index: 0, kind: input, shape index: {}]   ;;  %s879_s1 = inlined_call_operand.hbm [shape: bf16[128,128], index: 1, kind: input, shape index: {}]   ;;  %s880_s2 = inlined_call_operand.vmem [shape: f32[1,128], index: 2, kind: input, shape index: {}]   ;;  %s881_s3 = inlined_call_operand.hbm [shape: bf16[128,128], index: 3, kind: input, shape index: {}]   ;;  %s882_s4 = inlined_call_operand.vmem [shape: f32[1,128], index: 4, kind: input, shape index: {}]   ;;  %s883_s5 = inlined_call_operand.hbm [shape: bf16[128,128], index: 5, kind: input, shape index: {}]   ;;  %s884_s6 = inlined_call_operand.vmem [shape: f32[1,128], index: 6, kind: input, shape index: {}]   ;;  %s885_s7 = inlined_call_operand.hbm [shape: f32[8,128], index: 7, kind: output, shape index: {}]  }
   0x1   :  { %13 = vsyncpa [#allocation6], 0 }
   0x2   :  { %14 = vsyncpa [#allocation9], 0 }
   0x3   :  { %15 = vsyncpa [#allocation4], 0  ;;  %s721_s24 = smov [#allocation5]   ;;  %s603_s28 = scalar_lea.hbm %s879_s1, 1024 }
   0x4   :  { %s31_s25 = sshll.u32 %s721_s24, 4  ;;  %p604_p0 = scmp.ne.s32.totalorder %s879_s1, %s603_s28  ;;  %s32_s25 = int_to_ptr.vmem [resolvable:$true] %s31_s25 }
   0x5   :  { %p607_p1 = scmp.lt.u32.totalorder %s603_s28, %s879_s1 }
   0x7   :  { %p609_p2 = pnand %p607_p1, %p604_p0 }
   0x9   :  { %612 = shalt.err (!%p609_p2)
}
   0xa   :  { %s613_s10 = scalar_lea.vmem %s32_s25, 1024  ;;  %p618_p4 = scmp.lt.s32.totalorder %s32_s25, %s32_s25 }
   0xb   :  { %p614_p3 = scmp.ne.s32.totalorder %s32_s25, %s613_s10  ;;  %p619_p5 = scmp.lt.s32.totalorder %s613_s10, %s613_s10 }
   0xd   :  { %p620_p6 = por %p619_p5, %p618_p4 }
   0xf   :  { %p621_p7 = pnand %p620_p6, %p614_p3 }
  0x11   :  { %624 = shalt.err (!%p621_p7)
}
  0x12   :  { %s722_s11 = smov 64   ;;  %s723_s12 = smov 4  }
  0x13   :  { %37 = dma.hbm_to_vmem [thread:$0]  %s879_s1, 1024, %s32_s25, [#allocation6], %s722_s11, %s722_s11, %s723_s12  }
  0x14   :  { %s724_s15 = smov [#allocation2]   ;;  %s725_s17 = smov [#allocation7]  }
  0x15   :  { %s22_s16 = sshll.u32 %s724_s15, 4  ;;  %s45_s18 = sshll.u32 %s725_s17, 4  ;;  %s23_s16 = int_to_ptr.vmem [resolvable:$true] %s22_s16  ;;  %s46_s18 = int_to_ptr.vmem [resolvable:$true] %s45_s18 }
  0x16   :  { %s625_s21 = scalar_lea.hbm %s878_s0, 64 }
  0x17   :  { %p626_p8 = scmp.ne.s32.totalorder %s878_s0, %s625_s21  ;;  %p629_p9 = scmp.lt.u32.totalorder %s625_s21, %s878_s0 }
  0x19   :  { %p631_p10 = pnand %p629_p9, %p626_p8 }
  0x1b   :  { %634 = shalt.err (!%p631_p10)
}
  0x1c   :  { %s635_s1 = scalar_lea.vmem %s23_s16, 64  ;;  %p640_p12 = scmp.lt.s32.totalorder %s23_s16, %s23_s16 }
  0x1d   :  { %p636_p11 = scmp.ne.s32.totalorder %s23_s16, %s635_s1  ;;  %p641_p13 = scmp.lt.s32.totalorder %s635_s1, %s635_s1 }
  0x1f   :  { %p642_p0 = por %p641_p13, %p640_p12 }
  0x21   :  { %p643_p1 = pnand %p642_p0, %p636_p11 }
  0x23   :  { %646 = shalt.err (!%p643_p1)
}
  0x24   :  { %25 = dma.hbm_to_vmem [thread:$0]  %s878_s0, 64, %s23_s16, [#allocation3]  }
  0x25   :  { %s647_s30 = scalar_lea.hbm %s881_s3, 1024 }
  0x26   :  { %p648_p2 = scmp.ne.s32.totalorder %s881_s3, %s647_s30  ;;  %p651_p3 = scmp.lt.u32.totalorder %s647_s30, %s881_s3 }
  0x28   :  { %p653_p4 = pnand %p651_p3, %p648_p2 }
  0x2a   :  { %656 = shalt.err (!%p653_p4)
}
  0x2b   :  { %s657_s14 = scalar_lea.vmem %s46_s18, 1024  ;;  %p662_p6 = scmp.lt.s32.totalorder %s46_s18, %s46_s18 }
  0x2c   :  { %p658_p5 = scmp.ne.s32.totalorder %s46_s18, %s657_s14  ;;  %p663_p7 = scmp.lt.s32.totalorder %s657_s14, %s657_s14 }
  0x2e   :  { %p664_p8 = por %p663_p7, %p662_p6 }
  0x30   :  { %p665_p9 = pnand %p664_p8, %p658_p5 }
  0x32   :  { %668 = shalt.err (!%p665_p9)
}
  0x33   :  { %51 = dma.hbm_to_vmem [thread:$0]  %s881_s3, 1024, %s46_s18, [#allocation6], %s722_s11, %s722_s11, %s723_s12  }
  0x34   :  { %s726_s16 = smov [#allocation8]   ;;  %s669_s21 = scalar_lea.hbm %s883_s5, 1024 }
  0x35   :  { %s59_s17 = sshll.u32 %s726_s16, 4  ;;  %p670_p10 = scmp.ne.s32.totalorder %s883_s5, %s669_s21  ;;  %s60_s17 = int_to_ptr.vmem [resolvable:$true] %s59_s17 }
  0x36   :  { %p673_p11 = scmp.lt.u32.totalorder %s669_s21, %s883_s5 }
  0x38   :  { %p675_p12 = pnand %p673_p11, %p670_p10 }
  0x3a   :  { %678 = shalt.err (!%p675_p12)
}
  0x3b   :  { %s679_s1 = scalar_lea.vmem %s60_s17, 1024  ;;  %p684_p0 = scmp.lt.s32.totalorder %s60_s17, %s60_s17 }
  0x3c   :  { %p680_p13 = scmp.ne.s32.totalorder %s60_s17, %s679_s1  ;;  %p685_p1 = scmp.lt.s32.totalorder %s679_s1, %s679_s1 }
  0x3e   :  { %p686_p2 = por %p685_p1, %p684_p0 }
  0x40   :  { %p687_p3 = pnand %p686_p2, %p680_p13 }
  0x42   :  { %690 = shalt.err (!%p687_p3)
}
  0x43   :  { %65 = dma.hbm_to_vmem [thread:$0]  %s883_s5, 1024, %s60_s17, [#allocation9], %s722_s11, %s722_s11, %s723_s12  }
  0x44   :  { %713 = dma.done.wait [#allocation3], 64  }
  0x45   :  { %714 = vsyncadd [#allocation3], 4294967232 }
  0x46   :  { %715 = dma.done.wait [#allocation6], 2048  }
  0x47   :  { %716 = vsyncadd [#allocation6], 4294965248 }
  0x48   :  { %717 = dma.done.wait [#allocation9], 1024  }
  0x49   :  { %718 = vsyncadd [#allocation9], 4294966272  ;;  %v727_v0 = vmov 0.0   ;;  %vm728_vm0 = vmmov 0   ;;  %v575_v1 = vld [vmem:[#allocation5] sm:$0xff]   ;;  %v576_v2 = vld [vmem:[#allocation5 + $0x8] sm:$0xff]   ;;  %v419_v42 = vlaneseq }
  0x4a   :  { %506 = vmatprep.subr.bf16.mxu0 %v727_v0  ;;  %522 = vmatprep.mubr.msk.bf16.mxu0 %vm728_vm0, %v727_v0  ;;  %v577_v3 = vld [vmem:[#allocation5 + $0x10] sm:$0xff]   ;;  %v583_v4 = vld [vmem:[#allocation7] sm:$0xff]   ;;  %v578_v5 = vld [vmem:[#allocation5 + $0x18] sm:$0xff]  }
  0x4b   :  { %526 = vmatprep.subr.bf16.mxu1 %v727_v0  ;;  %542 = vmatprep.mubr.msk.bf16.mxu1 %vm728_vm0, %v727_v0  ;;  %v584_v6 = vld [vmem:[#allocation7 + $0x8] sm:$0xff]   ;;  %v579_v7 = vld [vmem:[#allocation5 + $0x20] sm:$0xff]   ;;  %v585_v8 = vld [vmem:[#allocation7 + $0x10] sm:$0xff]   ;;  %v420_v43 = vand.u32 127, %v419_v42 }
  0x4c   :  { %507 = vmatpush3.bf16.msra.mxu0 %v575_v1  ;;  %527 = vmatpush3.bf16.msra.mxu1 %v583_v4  ;;  %v580_v9 = vld [vmem:[#allocation5 + $0x28] sm:$0xff]   ;;  %v586_v10 = vld [vmem:[#allocation7 + $0x18] sm:$0xff]   ;;  %v581_v11 = vld [vmem:[#allocation5 + $0x30] sm:$0xff]  }
  0x4d   :  { %508 = vmatprep.subr.bf16.mxu0 %v727_v0  ;;  %528 = vmatprep.subr.bf16.mxu1 %v727_v0  ;;  %v587_v12 = vld [vmem:[#allocation7 + $0x20] sm:$0xff]   ;;  %v582_v13 = vld [vmem:[#allocation5 + $0x38] sm:$0xff]   ;;  %v588_v14 = vld [vmem:[#allocation7 + $0x28] sm:$0xff]   ;;  %vm421_vm1 = vcmp.lt.s32.totalorder %v420_v43, 10 }
  0x4e   :  { %v81_v15 = vld [vmem:[#allocation2] sm:$0xf]  ;;  %v589_v16 = vld [vmem:[#allocation7 + $0x30] sm:$0xff]   ;;  %v591_v18 = vld [vmem:[#allocation8] sm:$0xff]  }
  0x4f   :  { %v590_v17 = vld [vmem:[#allocation7 + $0x38] sm:$0xff]   ;;  %v592_v19 = vld [vmem:[#allocation8 + $0x8] sm:$0xff]   ;;  %v593_v20 = vld [vmem:[#allocation8 + $0x10] sm:$0xff]  }
  0x50   :  { %509 = vmatpush3.bf16.msra.mxu0 %v576_v2  ;;  %529 = vmatpush3.bf16.msra.mxu1 %v584_v6  ;;  %v594_v21 = vld [vmem:[#allocation8 + $0x18] sm:$0xff]   ;;  %v595_v22 = vld [vmem:[#allocation8 + $0x20] sm:$0xff]   ;;  %v596_v23 = vld [vmem:[#allocation8 + $0x28] sm:$0xff]  }
  0x51   :  { %510 = vmatprep.subr.bf16.mxu0 %v727_v0  ;;  %530 = vmatprep.subr.bf16.mxu1 %v727_v0  ;;  %v452_v24 = vld [vmem:[%s880_s2] ss:$0 sm:$0xff]  ;;  %v597_v32 = vld [vmem:[#allocation8 + $0x30] sm:$0xff]  }
  0x52   :  { %v598_v33 = vld [vmem:[#allocation8 + $0x38] sm:$0xff]  }
  0x53   :  { %v461_v34 = vld [vmem:[%s882_s4] ss:$0 sm:$0xff]  ;;  %s729_s4 = smov [#allocation10]  }
  0x54   :  { %511 = vmatpush3.bf16.msra.mxu0 %v577_v3  ;;  %531 = vmatpush3.bf16.msra.mxu1 %v585_v8  ;;  %v470_v44 = vld [vmem:[%s884_s6] ss:$0 sm:$0xff]  ;;  %s441_s6 = sshll.u32 %s729_s4, 4  ;;  %s442_s6 = int_to_ptr.vmem [resolvable:$true] %s441_s6 }
  0x55   :  { %512 = vmatprep.subr.bf16.mxu0 %v727_v0  ;;  %532 = vmatprep.subr.bf16.mxu1 %v727_v0  ;;  %s691_s28 = scalar_lea.vmem %s442_s6, 128  ;;  %p696_p5 = scmp.lt.s32.totalorder %s442_s6, %s442_s6 }
  0x56   :  { %p692_p4 = scmp.ne.s32.totalorder %s442_s6, %s691_s28  ;;  %p697_p6 = scmp.lt.s32.totalorder %s691_s28, %s691_s28 }
  0x58   :  { %513 = vmatpush3.bf16.msra.mxu0 %v578_v5  ;;  %533 = vmatpush3.bf16.msra.mxu1 %v586_v10  ;;  %p698_p7 = por %p697_p6, %p696_p5 }
  0x59   :  { %514 = vmatprep.subr.bf16.mxu0 %v727_v0  ;;  %534 = vmatprep.subr.bf16.mxu1 %v727_v0 }
  0x5a   :  { %p699_p8 = pnand %p698_p7, %p692_p4 }
  0x5c   :  { %515 = vmatpush3.bf16.msra.mxu0 %v579_v7  ;;  %535 = vmatpush3.bf16.msra.mxu1 %v587_v12 }
  0x5d   :  { %516 = vmatprep.subr.bf16.mxu0 %v727_v0  ;;  %536 = vmatprep.subr.bf16.mxu1 %v727_v0 }
  0x60   :  { %517 = vmatpush3.bf16.msra.mxu0 %v580_v9  ;;  %537 = vmatpush3.bf16.msra.mxu1 %v588_v14 }
  0x61   :  { %518 = vmatprep.subr.bf16.mxu0 %v727_v0  ;;  %538 = vmatprep.subr.bf16.mxu1 %v727_v0 }
  0x64   :  { %519 = vmatpush3.bf16.msra.mxu0 %v581_v11  ;;  %539 = vmatpush3.bf16.msra.mxu1 %v589_v16 }
  0x65   :  { %520 = vmatprep.subr.bf16.mxu0 %v727_v0  ;;  %540 = vmatprep.subr.bf16.mxu1 %v727_v0 }
  0x68   :  { %521 = vmatpush3.bf16.msra.mxu0 %v582_v13  ;;  %541 = vmatpush3.bf16.msra.mxu1 %v590_v17 }
  0x69   :  { %546 = vmatprep.subr.bf16.mxu0 %v727_v0 }
  0x6b   :  { %523 = vmatmul.mubr.bf16.vlgmr.msra.gmra.mrb[0].mxu0 %v81_v15 }
  0x6c   :  { %562 = vmatprep.mubr.msk.bf16.mxu0 %vm728_vm0, %v727_v0  ;;  %547 = vmatpush3.bf16.msra.mxu0 %v591_v18 }
  0x6d   :  { %548 = vmatprep.subr.bf16.mxu0 %v727_v0 }
  0x70   :  { %549 = vmatpush3.bf16.msra.mxu0 %v592_v19 }
  0x71   :  { %550 = vmatprep.subr.bf16.mxu0 %v727_v0 }
  0x74   :  { %551 = vmatpush3.bf16.msra.mxu0 %v593_v20 }
  0x75   :  { %552 = vmatprep.subr.bf16.mxu0 %v727_v0 }
  0x78   :  { %553 = vmatpush3.bf16.msra.mxu0 %v594_v21 }
  0x79   :  { %554 = vmatprep.subr.bf16.mxu0 %v727_v0 }
  0x7c   :  { %555 = vmatpush3.bf16.msra.mxu0 %v595_v22 }
  0x7d   :  { %556 = vmatprep.subr.bf16.mxu0 %v727_v0 }
  0x80   :  { %557 = vmatpush3.bf16.msra.mxu0 %v596_v23 }
  0x81   :  { %558 = vmatprep.subr.bf16.mxu0 %v727_v0 }
  0x84   :  { %559 = vmatpush3.bf16.msra.mxu0 %v597_v32 }
  0x85   :  { %560 = vmatprep.subr.bf16.mxu0 %v727_v0 }
  0x88   :  { %561 = vmatpush3.bf16.msra.mxu0 %v598_v33 }
 0x13e   :  { %v187_v25 = vpop.f32.mrb[0].mxu0 }
 0x13f   :  { %v188_v26 = vadd.f32 %v452_v24, %v187_v25  ;;  %v524_v27 = vpop.f32.mrb[1].mxu0 }
 0x140   :  { %v190_v28 = vpop.f32.mrb[2].mxu0 }
 0x141   :  { %v193_v29 = vmax.f32 %v188_v26, 0.0  ;;  %v525_v30 = vpop.f32.mrb[3].mxu0 }
 0x143   :  { %v194_v31 = vpack.c.bf16 %v193_v29, %v193_v29 }
 0x145   :  { %543 = vmatmul.mubr.bf16.vlgmr.msra.gmra.mrb[0].mxu1 %v194_v31 }
 0x218   :  { %v300_v35 = vpop.f32.mrb[0].mxu1 }
 0x219   :  { %v301_v36 = vadd.f32 %v461_v34, %v300_v35  ;;  %v544_v37 = vpop.f32.mrb[1].mxu1 }
 0x21a   :  { %v303_v38 = vpop.f32.mrb[2].mxu1 }
 0x21b   :  { %v306_v39 = vmax.f32 %v301_v36, 0.0  ;;  %v545_v40 = vpop.f32.mrb[3].mxu1 }
 0x21d   :  { %v307_v41 = vpack.c.bf16 %v306_v39, %v306_v39 }
 0x21f   :  { %563 = vmatmul.mubr.bf16.vlgmr.msra.gmra.mrb[4].mxu0 %v307_v41 }
 0x2f2   :  { %v413_v45 = vpop.f32.mrb[4].mxu0 }
 0x2f3   :  { %v414_v46 = vadd.f32 %v470_v44, %v413_v45  ;;  %v564_v47 = vpop.f32.mrb[5].mxu0 }
 0x2f4   :  { %v416_v48 = vpop.f32.mrb[6].mxu0 }
 0x2f5   :  { %v565_v49 = vpop.f32.mrb[7].mxu0  ;;  %v422_v50 = vsel %vm421_vm1, %v414_v46, -inf }
 0x2f6   :  { %423 = vmax.xlane.f32.xlu0 %v422_v50 }
 0x383   :  { %v424_v51 = vpop.xlane.xlu0 %423 }
 0x384   :  { %v425_v52 = vsub.f32 %v422_v50, %v424_v51 }
 0x386   :  { %v426_v53 = vmul.f32 1.442695, %v425_v52 }
 0x388   :  { %599 = vpow2.f32 %v426_v53 }
 0x392   :  { %v600_v54 = vpop.eup %599 }
 0x393   :  { %428 = vadd.xlane.f32.xlu0 %v600_v54 }
 0x420   :  { %v429_v55 = vpop.xlane.xlu0 %428 }
 0x421   :  { %601 = vlog2.f32 %v429_v55 }
 0x42b   :  { %v602_v56 = vpop.eup %601 }
 0x42c   :  { %v431_v57 = vmul.f32 0.6931472, %v602_v56 }
 0x42e   :  { %v432_v58 = vadd.f32 %v431_v57, %v424_v51 }
 0x430   :  { %v433_v59 = vsub.f32 %v414_v46, %v432_v58 }
 0x432   :  { %434 = vst [vmem:[#allocation10] sm:$0xff] %v433_v59 }
 0x433   :  { %702 = shalt.err (!%p699_p8)
}
 0x434   :  { %s703_s8 = scalar_lea.hbm %s885_s7, 128 }
 0x435   :  { %p704_p9 = scmp.ne.s32.totalorder %s885_s7, %s703_s8  ;;  %p707_p10 = scmp.lt.u32.totalorder %s703_s8, %s885_s7 }
 0x437   :  { %p709_p11 = pnand %p707_p10, %p704_p9 }
 0x439   :  { %712 = shalt.err (!%p709_p11)
}
 0x43a   :  { %444 = dma.vmem_to_hbm [thread:$0]  %s442_s6, 128, %s885_s7, [#allocation4]  }
 0x43b   :  { %719 = dma.done.wait [#allocation4], 128  }
 0x43c   :  { %720 = vsyncadd [#allocation4], 4294967168 }
 0x43d   :  { %448 = vsyncpa [#allocation3], 1 }
 0x43e   :  { %449 = vsyncpa [#allocation6], 1 }
 0x43f   :  { %450 = vsyncpa [#allocation9], 1 }
 0x440   :  { %451 = vsyncpa [#allocation4], 1 }

</bundles_post_ra>
